<compile_context>
chip_gen: v7x
topology: tpu7x:2x2x1
jax: 0.10.0
libtpu: 0.0.40
codegen_flags: <defaults>
</compile_context>

<pallas_src>
import functools

import jax
import jax.numpy as jnp
from jax.experimental import pallas as pl
from jax.experimental.pallas import tpu as pltpu


# ---------------------------------------------------------------------------
# In-kernel helper: 3x3 "same" conv (stride 1) + folded-BN bias + SiLU.
# x        : (Cin, H*W)      activation, channels on sublanes, H*W on lanes
# w_taps   : (9, Cout, Cin)  conv weights (BN scale already folded in),
#                            tap index = kh*3 + kw
# bias     : (Cout, 1)       folded BatchNorm bias
# mask_l/r : (1, H*W)        multiplicative masks zeroing the w==0 / w==W-1
#                            columns (horizontal zero-padding at row edges)
# Returns (Cout, H*W) float32.
# ---------------------------------------------------------------------------
def _conv3x3_bn_silu(x, w_taps, bias, mask_left, mask_right, *, W, pad):
    cin, hw = x.shape

    # In-kernel zero extension of the flattened row: vertical out-of-range
    # taps land in the zero blocks, so no HBM-side jnp.pad is needed.
    # Pieces are 128-lane aligned (pad is a multiple of 128).
    zero = jnp.zeros((cin, pad), x.dtype)
    xb = jnp.concatenate([zero, x, zero], axis=1)  # (cin, hw + 2*pad)

    acc = None
    for kh in range(3):
        for kw in range(3):
            # tap offset in the flattened (h*W + w) index
            off = (kh - 1) * W + (kw - 1)
            start = pad + off
            t = xb[:, start:start + hw]            # shifted lane view, (cin, hw)
            # horizontal zero padding: kill the column that wrapped across rows
            if kw == 0:
                t = t * mask_left
            elif kw == 2:
                t = t * mask_right
            d = jnp.dot(w_taps[kh * 3 + kw], t,
                        preferred_element_type=jnp.float32)  # (Cout, hw) f32
            acc = d if acc is None else acc + d

    y = acc + bias                                  # folded BatchNorm bias
    # SiLU: y * sigmoid(y); reciprocal on the EUP (separate VLIW slot)
    return y * pl.reciprocal(1.0 + jnp.exp(-y), approx=True)


# ---------------------------------------------------------------------------
# Fused Bottleneck kernel: y = [x +] cv2(cv1(x)) for one batch element.
# ---------------------------------------------------------------------------
def _bottleneck_kernel(x_ref, ml_ref, mr_ref, w1_ref, b1_ref, w2_ref, b2_ref,
                       out_ref, *, W, pad, add):
    x = x_ref[0]                 # (C1, H*W) in the native input dtype
    ml = ml_ref[...]             # (1, H*W)
    mr = mr_ref[...]             # (1, H*W)

    h1 = _conv3x3_bn_silu(x, w1_ref[...], b1_ref[...], ml, mr, W=W, pad=pad)
    y = _conv3x3_bn_silu(h1, w2_ref[...], b2_ref[...], ml, mr, W=W, pad=pad)

    if add:
        y = y + x.astype(jnp.float32)

    out_ref[0] = y.astype(out_ref.dtype)   # (C2, H*W): lane-dense store


# ---------------------------------------------------------------------------
# Wrapper: NCHW in, NCHW out, no transposes, no HBM padding.
# ---------------------------------------------------------------------------
@functools.partial(jax.jit, static_argnames=("shortcut",))
def bottleneck_forward(x_nchw, params, shortcut=True):
    N, C1, H, W = x_nchw.shape
    C_ = params["w1_taps"].shape[1]
    C2 = params["w2_taps"].shape[1]
    add = bool(shortcut) and (C1 == C2)
    HW = H * W
    pad = ((W + 1 + 127) // 128) * 128     # lane-aligned zero-extension width
    assert pad >= W + 1

    # Free row-major reshapes: NCHW <-> (N, C, H*W). No transposes anywhere.
    x_flat = x_nchw.reshape(N, C1, HW)

    # Column masks for the horizontal taps (computed once in XLA, constant).
    col = jnp.arange(HW, dtype=jnp.int32) % W
    mask_left = (col > 0).astype(x_nchw.dtype).reshape(1, HW)
    mask_right = (col < (W - 1)).astype(x_nchw.dtype).reshape(1, HW)

    kernel = functools.partial(_bottleneck_kernel, W=W, pad=pad, add=add)

    out_flat = pl.pallas_call(
        kernel,
        out_shape=jax.ShapeDtypeStruct((N, C2, HW), x_nchw.dtype),
        grid=(N,),
        in_specs=[
            pl.BlockSpec((1, C1, HW), lambda n: (n, 0, 0)),     # x
            pl.BlockSpec((1, HW), lambda n: (0, 0)),            # mask_left
            pl.BlockSpec((1, HW), lambda n: (0, 0)),            # mask_right
            pl.BlockSpec((9, C_, C1), lambda n: (0, 0, 0)),     # cv1 weights
            pl.BlockSpec((C_, 1), lambda n: (0, 0)),            # cv1 bias
            pl.BlockSpec((9, C2, C_), lambda n: (0, 0, 0)),     # cv2 weights
            pl.BlockSpec((C2, 1), lambda n: (0, 0)),            # cv2 bias
        ],
        out_specs=pl.BlockSpec((1, C2, HW), lambda n: (n, 0, 0)),
        compiler_params=pltpu.CompilerParams(
            dimension_semantics=("parallel",),   # batch across megacore TCs
        ),
    )(x_flat, mask_left, mask_right,
      params["w1_taps"], params["b1"], params["w2_taps"], params["b2"])

    return out_flat.reshape(N, C2, H, W)


# ---------------------------------------------------------------------------
# Parameter setup (deterministic, synthetic) with BN(eval) folded into weights.
# ---------------------------------------------------------------------------
def init_bottleneck_params(key, c1, c2, e=0.5):
    c_ = int(c2 * e)
    ks = jax.random.split(key, 10)
    eps = 1e-5  # nn.BatchNorm2d default

    def bn_fold(kg, kb, km, kv, c):
        gamma = 1.0 + 0.1 * jax.random.normal(kg, (c,), jnp.float32)
        beta = 0.1 * jax.random.normal(kb, (c,), jnp.float32)
        mean = 0.1 * jax.random.normal(km, (c,), jnp.float32)
        var = 1.0 + 0.5 * jax.random.uniform(kv, (c,), jnp.float32)
        scale = gamma / jnp.sqrt(var + eps)
        bias = beta - mean * scale
        return scale, bias

    # torch OIHW conv weights
    w1_oihw = 0.1 * jax.random.normal(ks[0], (c_, c1, 3, 3), jnp.float32)
    w2_oihw = 0.1 * jax.random.normal(ks[1], (c2, c_, 3, 3), jnp.float32)
    s1, b1 = bn_fold(ks[2], ks[3], ks[4], ks[5], c_)
    s2, b2 = bn_fold(ks[6], ks[7], ks[8], ks[9], c2)

    def fold_taps(w_oihw, scale):
        cout, cin = w_oihw.shape[:2]
        w = w_oihw * scale[:, None, None, None]          # fold BN scale into conv
        # (Cout, Cin, kh, kw) -> (kh, kw, Cout, Cin) -> (9, Cout, Cin), tap = kh*3+kw
        return jnp.transpose(w, (2, 3, 0, 1)).reshape(9, cout, cin)

    params = {
        "w1_taps": fold_taps(w1_oihw, s1), "b1": b1.reshape(c_, 1),
        "w2_taps": fold_taps(w2_oihw, s2), "b2": b2.reshape(c2, 1),
    }
    ref_params = {
        "w1_oihw": w1_oihw, "scale1": s1, "bias1": b1,
        "w2_oihw": w2_oihw, "scale2": s2, "bias2": b2,
    }
    return params, ref_params


# ---------------------------------------------------------------------------
# Pure-JAX (XLA) reference, matching the PyTorch Bottleneck in eval mode.
# ---------------------------------------------------------------------------
def bottleneck_reference(x, ref_params, shortcut=True):
    def conv_block(z, w_oihw, scale, bias):
        y = jax.lax.conv_general_dilated(
            z, w_oihw, window_strides=(1, 1), padding=((1, 1), (1, 1)),
            dimension_numbers=("NCHW", "OIHW", "NCHW"),
            precision=jax.lax.Precision.HIGHEST)
        y = y * scale[None, :, None, None] + bias[None, :, None, None]
        return y * jax.nn.sigmoid(y)

    y1 = conv_block(x, ref_params["w1_oihw"], ref_params["scale1"], ref_params["bias1"])
    y2 = conv_block(y1, ref_params["w2_oihw"], ref_params["scale2"], ref_params["bias2"])
    return x + y2 if (shortcut and x.shape[1] == y2.shape[1]) else y2


if __name__ == "__main__":
    key = jax.random.PRNGKey(0)
    k_x, k_p = jax.random.split(key)

    # Bottleneck(c1=4, c2=4, shortcut=True, k=(3,3), e=0.5) -> c_ = 2
    c1 = c2 = 4
    x = jax.random.normal(k_x, (2, c1, 16, 16), jnp.float32)  # NCHW
    params, ref_params = init_bottleneck_params(k_p, c1, c2, e=0.5)

    out = bottleneck_forward(x, params, shortcut=True)
    jax.block_until_ready(out)
    assert out.shape == (2, c2, 16, 16)

    # Numerical sanity check against the pure-XLA reference (tolerance is loose
    # enough to absorb MXU-pass precision and the EUP approx reciprocal).
    ref = bottleneck_reference(x, ref_params, shortcut=True)
    max_err = float(jnp.max(jnp.abs(out - ref)))
    assert max_err < 5e-2, f"kernel/reference mismatch: max abs err = {max_err}"

    print("KERNEL_OK")
</pallas_src>

<mosaic_0001>
module attributes {stable_mosaic.version = 11 : i64} {
  func.func @_bottleneck_kernel(%arg0: i32, %arg1: memref<1x4x256xf32, #tpu.memory_space<vmem>>, %arg2: memref<1x256xf32, #tpu.memory_space<vmem>>, %arg3: memref<1x256xf32, #tpu.memory_space<vmem>>, %arg4: memref<9x2x4xf32, #tpu.memory_space<vmem>>, %arg5: memref<2x1xf32, #tpu.memory_space<vmem>>, %arg6: memref<9x4x2xf32, #tpu.memory_space<vmem>>, %arg7: memref<4x1xf32, #tpu.memory_space<vmem>>, %arg8: memref<1x4x256xf32, #tpu.memory_space<vmem>>) attributes {dimension_semantics = [#tpu.dimension_semantics<parallel>], iteration_bounds = array<i64: 2>, scalar_prefetch = 0 : i64, scratch_operands = 0 : i64, tpu.core_type = #tpu.core_type<tc>, window_params = [{transform_indices = @transform_0, window_bounds = array<i64: 1, 4, 256>}, {pipeline_mode = #tpu.pipeline_mode<synchronous>, transform_indices = @transform_1, window_bounds = array<i64: 1, 256>}, {pipeline_mode = #tpu.pipeline_mode<synchronous>, transform_indices = @transform_2, window_bounds = array<i64: 1, 256>}, {pipeline_mode = #tpu.pipeline_mode<synchronous>, transform_indices = @transform_3, window_bounds = array<i64: 9, 2, 4>}, {pipeline_mode = #tpu.pipeline_mode<synchronous>, transform_indices = @transform_4, window_bounds = array<i64: 2, 1>}, {pipeline_mode = #tpu.pipeline_mode<synchronous>, transform_indices = @transform_5, window_bounds = array<i64: 9, 4, 2>}, {pipeline_mode = #tpu.pipeline_mode<synchronous>, transform_indices = @transform_6, window_bounds = array<i64: 4, 1>}, {transform_indices = @transform_7, window_bounds = array<i64: 1, 4, 256>}]} {
    %c0 = arith.constant 0 : index
    %c0_0 = arith.constant 0 : index
    %c0_1 = arith.constant 0 : index
    %0 = vector.load %arg1[%c0, %c0_0, %c0_1] : memref<1x4x256xf32, #tpu.memory_space<vmem>>, vector<1x4x256xf32>
    %1 = vector.shape_cast %0 : vector<1x4x256xf32> to vector<4x256xf32>
    %c0_2 = arith.constant 0 : index
    %c0_3 = arith.constant 0 : index
    %2 = vector.load %arg2[%c0_2, %c0_3] : memref<1x256xf32, #tpu.memory_space<vmem>>, vector<1x256xf32>
    %c0_4 = arith.constant 0 : index
    %c0_5 = arith.constant 0 : index
    %3 = vector.load %arg3[%c0_4, %c0_5] : memref<1x256xf32, #tpu.memory_space<vmem>>, vector<1x256xf32>
    %c0_6 = arith.constant 0 : index
    %c0_7 = arith.constant 0 : index
    %c0_8 = arith.constant 0 : index
    %4 = vector.load %arg4[%c0_6, %c0_7, %c0_8] : memref<9x2x4xf32, #tpu.memory_space<vmem>>, vector<9x2x4xf32>
    %c0_9 = arith.constant 0 : index
    %c0_10 = arith.constant 0 : index
    %5 = vector.load %arg5[%c0_9, %c0_10] : memref<2x1xf32, #tpu.memory_space<vmem>>, vector<2x1xf32>
    %cst = arith.constant 0.000000e+00 : f32
    %6 = vector.broadcast %cst : f32 to vector<4x128xf32>
    %7 = tpu.concatenate %6, %1, %6 in 1 : vector<4x128xf32>, vector<4x256xf32>, vector<4x128xf32> -> vector<4x512xf32>
    %8 = vector.extract_strided_slice %7 {offsets = [0, 111], sizes = [4, 256], strides = [1, 1]} : vector<4x512xf32> to vector<4x256xf32>
    %9 = vector.broadcast %2 : vector<1x256xf32> to vector<4x256xf32>
    %10 = arith.mulf %8, %9 : vector<4x256xf32>
    %11 = vector.extract_strided_slice %4 {offsets = [0, 0, 0], sizes = [1, 2, 4], strides = [1, 1, 1]} : vector<9x2x4xf32> to vector<1x2x4xf32>
    %12 = vector.shape_cast %11 : vector<1x2x4xf32> to vector<2x4xf32>
    %cst_11 = arith.constant dense<0.000000e+00> : vector<2x256xf32>
    %13 = tpu.matmul %12, %10, %cst_11 {dimension_numbers = #tpu.dot_dimension_numbers<[1], [0], [0], [1], [0, 0, 1, 1], [], []>} : vector<2x4xf32>, vector<4x256xf32>, vector<2x256xf32> -> vector<2x256xf32>
    %14 = vector.extract_strided_slice %7 {offsets = [0, 112], sizes = [4, 256], strides = [1, 1]} : vector<4x512xf32> to vector<4x256xf32>
    %15 = vector.extract_strided_slice %4 {offsets = [1, 0, 0], sizes = [1, 2, 4], strides = [1, 1, 1]} : vector<9x2x4xf32> to vector<1x2x4xf32>
    %16 = vector.shape_cast %15 : vector<1x2x4xf32> to vector<2x4xf32>
    %cst_12 = arith.constant dense<0.000000e+00> : vector<2x256xf32>
    %17 = tpu.matmul %16, %14, %cst_12 {dimension_numbers = #tpu.dot_dimension_numbers<[1], [0], [0], [1], [0, 0, 1, 1], [], []>} : vector<2x4xf32>, vector<4x256xf32>, vector<2x256xf32> -> vector<2x256xf32>
    %18 = arith.addf %13, %17 : vector<2x256xf32>
    %19 = vector.extract_strided_slice %7 {offsets = [0, 113], sizes = [4, 256], strides = [1, 1]} : vector<4x512xf32> to vector<4x256xf32>
    %20 = vector.broadcast %3 : vector<1x256xf32> to vector<4x256xf32>
    %21 = arith.mulf %19, %20 : vector<4x256xf32>
    %22 = vector.extract_strided_slice %4 {offsets = [2, 0, 0], sizes = [1, 2, 4], strides = [1, 1, 1]} : vector<9x2x4xf32> to vector<1x2x4xf32>
    %23 = vector.shape_cast %22 : vector<1x2x4xf32> to vector<2x4xf32>
    %cst_13 = arith.constant dense<0.000000e+00> : vector<2x256xf32>
    %24 = tpu.matmul %23, %21, %cst_13 {dimension_numbers = #tpu.dot_dimension_numbers<[1], [0], [0], [1], [0, 0, 1, 1], [], []>} : vector<2x4xf32>, vector<4x256xf32>, vector<2x256xf32> -> vector<2x256xf32>
    %25 = arith.addf %18, %24 : vector<2x256xf32>
    %26 = vector.extract_strided_slice %7 {offsets = [0, 127], sizes = [4, 256], strides = [1, 1]} : vector<4x512xf32> to vector<4x256xf32>
    %27 = vector.broadcast %2 : vector<1x256xf32> to vector<4x256xf32>
    %28 = arith.mulf %26, %27 : vector<4x256xf32>
    %29 = vector.extract_strided_slice %4 {offsets = [3, 0, 0], sizes = [1, 2, 4], strides = [1, 1, 1]} : vector<9x2x4xf32> to vector<1x2x4xf32>
    %30 = vector.shape_cast %29 : vector<1x2x4xf32> to vector<2x4xf32>
    %cst_14 = arith.constant dense<0.000000e+00> : vector<2x256xf32>
    %31 = tpu.matmul %30, %28, %cst_14 {dimension_numbers = #tpu.dot_dimension_numbers<[1], [0], [0], [1], [0, 0, 1, 1], [], []>} : vector<2x4xf32>, vector<4x256xf32>, vector<2x256xf32> -> vector<2x256xf32>
    %32 = arith.addf %25, %31 : vector<2x256xf32>
    %33 = vector.extract_strided_slice %7 {offsets = [0, 128], sizes = [4, 256], strides = [1, 1]} : vector<4x512xf32> to vector<4x256xf32>
    %34 = vector.extract_strided_slice %4 {offsets = [4, 0, 0], sizes = [1, 2, 4], strides = [1, 1, 1]} : vector<9x2x4xf32> to vector<1x2x4xf32>
    %35 = vector.shape_cast %34 : vector<1x2x4xf32> to vector<2x4xf32>
    %cst_15 = arith.constant dense<0.000000e+00> : vector<2x256xf32>
    %36 = tpu.matmul %35, %33, %cst_15 {dimension_numbers = #tpu.dot_dimension_numbers<[1], [0], [0], [1], [0, 0, 1, 1], [], []>} : vector<2x4xf32>, vector<4x256xf32>, vector<2x256xf32> -> vector<2x256xf32>
    %37 = arith.addf %32, %36 : vector<2x256xf32>
    %38 = vector.extract_strided_slice %7 {offsets = [0, 129], sizes = [4, 256], strides = [1, 1]} : vector<4x512xf32> to vector<4x256xf32>
    %39 = vector.broadcast %3 : vector<1x256xf32> to vector<4x256xf32>
    %40 = arith.mulf %38, %39 : vector<4x256xf32>
    %41 = vector.extract_strided_slice %4 {offsets = [5, 0, 0], sizes = [1, 2, 4], strides = [1, 1, 1]} : vector<9x2x4xf32> to vector<1x2x4xf32>
    %42 = vector.shape_cast %41 : vector<1x2x4xf32> to vector<2x4xf32>
    %cst_16 = arith.constant dense<0.000000e+00> : vector<2x256xf32>
    %43 = tpu.matmul %42, %40, %cst_16 {dimension_numbers = #tpu.dot_dimension_numbers<[1], [0], [0], [1], [0, 0, 1, 1], [], []>} : vector<2x4xf32>, vector<4x256xf32>, vector<2x256xf32> -> vector<2x256xf32>
    %44 = arith.addf %37, %43 : vector<2x256xf32>
    %45 = vector.extract_strided_slice %7 {offsets = [0, 143], sizes = [4, 256], strides = [1, 1]} : vector<4x512xf32> to vector<4x256xf32>
    %46 = vector.broadcast %2 : vector<1x256xf32> to vector<4x256xf32>
    %47 = arith.mulf %45, %46 : vector<4x256xf32>
    %48 = vector.extract_strided_slice %4 {offsets = [6, 0, 0], sizes = [1, 2, 4], strides = [1, 1, 1]} : vector<9x2x4xf32> to vector<1x2x4xf32>
    %49 = vector.shape_cast %48 : vector<1x2x4xf32> to vector<2x4xf32>
    %cst_17 = arith.constant dense<0.000000e+00> : vector<2x256xf32>
    %50 = tpu.matmul %49, %47, %cst_17 {dimension_numbers = #tpu.dot_dimension_numbers<[1], [0], [0], [1], [0, 0, 1, 1], [], []>} : vector<2x4xf32>, vector<4x256xf32>, vector<2x256xf32> -> vector<2x256xf32>
    %51 = arith.addf %44, %50 : vector<2x256xf32>
    %52 = vector.extract_strided_slice %7 {offsets = [0, 144], sizes = [4, 256], strides = [1, 1]} : vector<4x512xf32> to vector<4x256xf32>
    %53 = vector.extract_strided_slice %4 {offsets = [7, 0, 0], sizes = [1, 2, 4], strides = [1, 1, 1]} : vector<9x2x4xf32> to vector<1x2x4xf32>
    %54 = vector.shape_cast %53 : vector<1x2x4xf32> to vector<2x4xf32>
    %cst_18 = arith.constant dense<0.000000e+00> : vector<2x256xf32>
    %55 = tpu.matmul %54, %52, %cst_18 {dimension_numbers = #tpu.dot_dimension_numbers<[1], [0], [0], [1], [0, 0, 1, 1], [], []>} : vector<2x4xf32>, vector<4x256xf32>, vector<2x256xf32> -> vector<2x256xf32>
    %56 = arith.addf %51, %55 : vector<2x256xf32>
    %57 = vector.extract_strided_slice %7 {offsets = [0, 145], sizes = [4, 256], strides = [1, 1]} : vector<4x512xf32> to vector<4x256xf32>
    %58 = vector.broadcast %3 : vector<1x256xf32> to vector<4x256xf32>
    %59 = arith.mulf %57, %58 : vector<4x256xf32>
    %60 = vector.extract_strided_slice %4 {offsets = [8, 0, 0], sizes = [1, 2, 4], strides = [1, 1, 1]} : vector<9x2x4xf32> to vector<1x2x4xf32>
    %61 = vector.shape_cast %60 : vector<1x2x4xf32> to vector<2x4xf32>
    %cst_19 = arith.constant dense<0.000000e+00> : vector<2x256xf32>
    %62 = tpu.matmul %61, %59, %cst_19 {dimension_numbers = #tpu.dot_dimension_numbers<[1], [0], [0], [1], [0, 0, 1, 1], [], []>} : vector<2x4xf32>, vector<4x256xf32>, vector<2x256xf32> -> vector<2x256xf32>
    %63 = arith.addf %56, %62 : vector<2x256xf32>
    %64 = vector.broadcast %5 : vector<2x1xf32> to vector<2x256xf32>
    %65 = arith.addf %63, %64 : vector<2x256xf32>
    %cst_20 = arith.constant 0.000000e+00 : f32
    %66 = vector.broadcast %cst_20 : f32 to vector<2x256xf32>
    %67 = arith.subf %66, %65 : vector<2x256xf32>
    %68 = math.exp %67 : vector<2x256xf32>
    %cst_21 = arith.constant 1.000000e+00 : f32
    %69 = vector.broadcast %cst_21 : f32 to vector<2x256xf32>
    %70 = arith.addf %69, %68 : vector<2x256xf32>
    %71 = tpu.reciprocal %70 {approx = true} : vector<2x256xf32> -> vector<2x256xf32>
    %72 = arith.mulf %65, %71 : vector<2x256xf32>
    %c0_22 = arith.constant 0 : index
    %c0_23 = arith.constant 0 : index
    %c0_24 = arith.constant 0 : index
    %73 = vector.load %arg6[%c0_22, %c0_23, %c0_24] : memref<9x4x2xf32, #tpu.memory_space<vmem>>, vector<9x4x2xf32>
    %c0_25 = arith.constant 0 : index
    %c0_26 = arith.constant 0 : index
    %74 = vector.load %arg7[%c0_25, %c0_26] : memref<4x1xf32, #tpu.memory_space<vmem>>, vector<4x1xf32>
    %cst_27 = arith.constant 0.000000e+00 : f32
    %75 = vector.broadcast %cst_27 : f32 to vector<2x128xf32>
    %76 = tpu.concatenate %75, %72, %75 in 1 : vector<2x128xf32>, vector<2x256xf32>, vector<2x128xf32> -> vector<2x512xf32>
    %77 = vector.extract_strided_slice %76 {offsets = [0, 111], sizes = [2, 256], strides = [1, 1]} : vector<2x512xf32> to vector<2x256xf32>
    %78 = vector.broadcast %2 : vector<1x256xf32> to vector<2x256xf32>
    %79 = arith.mulf %77, %78 : vector<2x256xf32>
    %80 = vector.extract_strided_slice %73 {offsets = [0, 0, 0], sizes = [1, 4, 2], strides = [1, 1, 1]} : vector<9x4x2xf32> to vector<1x4x2xf32>
    %81 = vector.shape_cast %80 : vector<1x4x2xf32> to vector<4x2xf32>
    %cst_28 = arith.constant dense<0.000000e+00> : vector<4x256xf32>
    %82 = tpu.matmul %81, %79, %cst_28 {dimension_numbers = #tpu.dot_dimension_numbers<[1], [0], [0], [1], [0, 0, 1, 1], [], []>} : vector<4x2xf32>, vector<2x256xf32>, vector<4x256xf32> -> vector<4x256xf32>
    %83 = vector.extract_strided_slice %76 {offsets = [0, 112], sizes = [2, 256], strides = [1, 1]} : vector<2x512xf32> to vector<2x256xf32>
    %84 = vector.extract_strided_slice %73 {offsets = [1, 0, 0], sizes = [1, 4, 2], strides = [1, 1, 1]} : vector<9x4x2xf32> to vector<1x4x2xf32>
    %85 = vector.shape_cast %84 : vector<1x4x2xf32> to vector<4x2xf32>
    %cst_29 = arith.constant dense<0.000000e+00> : vector<4x256xf32>
    %86 = tpu.matmul %85, %83, %cst_29 {dimension_numbers = #tpu.dot_dimension_numbers<[1], [0], [0], [1], [0, 0, 1, 1], [], []>} : vector<4x2xf32>, vector<2x256xf32>, vector<4x256xf32> -> vector<4x256xf32>
    %87 = arith.addf %82, %86 : vector<4x256xf32>
    %88 = vector.extract_strided_slice %76 {offsets = [0, 113], sizes = [2, 256], strides = [1, 1]} : vector<2x512xf32> to vector<2x256xf32>
    %89 = vector.broadcast %3 : vector<1x256xf32> to vector<2x256xf32>
    %90 = arith.mulf %88, %89 : vector<2x256xf32>
    %91 = vector.extract_strided_slice %73 {offsets = [2, 0, 0], sizes = [1, 4, 2], strides = [1, 1, 1]} : vector<9x4x2xf32> to vector<1x4x2xf32>
    %92 = vector.shape_cast %91 : vector<1x4x2xf32> to vector<4x2xf32>
    %cst_30 = arith.constant dense<0.000000e+00> : vector<4x256xf32>
    %93 = tpu.matmul %92, %90, %cst_30 {dimension_numbers = #tpu.dot_dimension_numbers<[1], [0], [0], [1], [0, 0, 1, 1], [], []>} : vector<4x2xf32>, vector<2x256xf32>, vector<4x256xf32> -> vector<4x256xf32>
    %94 = arith.addf %87, %93 : vector<4x256xf32>
    %95 = vector.extract_strided_slice %76 {offsets = [0, 127], sizes = [2, 256], strides = [1, 1]} : vector<2x512xf32> to vector<2x256xf32>
    %96 = vector.broadcast %2 : vector<1x256xf32> to vector<2x256xf32>
    %97 = arith.mulf %95, %96 : vector<2x256xf32>
    %98 = vector.extract_strided_slice %73 {offsets = [3, 0, 0], sizes = [1, 4, 2], strides = [1, 1, 1]} : vector<9x4x2xf32> to vector<1x4x2xf32>
    %99 = vector.shape_cast %98 : vector<1x4x2xf32> to vector<4x2xf32>
    %cst_31 = arith.constant dense<0.000000e+00> : vector<4x256xf32>
    %100 = tpu.matmul %99, %97, %cst_31 {dimension_numbers = #tpu.dot_dimension_numbers<[1], [0], [0], [1], [0, 0, 1, 1], [], []>} : vector<4x2xf32>, vector<2x256xf32>, vector<4x256xf32> -> vector<4x256xf32>
    %101 = arith.addf %94, %100 : vector<4x256xf32>
    %102 = vector.extract_strided_slice %76 {offsets = [0, 128], sizes = [2, 256], strides = [1, 1]} : vector<2x512xf32> to vector<2x256xf32>
    %103 = vector.extract_strided_slice %73 {offsets = [4, 0, 0], sizes = [1, 4, 2], strides = [1, 1, 1]} : vector<9x4x2xf32> to vector<1x4x2xf32>
    %104 = vector.shape_cast %103 : vector<1x4x2xf32> to vector<4x2xf32>
    %cst_32 = arith.constant dense<0.000000e+00> : vector<4x256xf32>
    %105 = tpu.matmul %104, %102, %cst_32 {dimension_numbers = #tpu.dot_dimension_numbers<[1], [0], [0], [1], [0, 0, 1, 1], [], []>} : vector<4x2xf32>, vector<2x256xf32>, vector<4x256xf32> -> vector<4x256xf32>
    %106 = arith.addf %101, %105 : vector<4x256xf32>
    %107 = vector.extract_strided_slice %76 {offsets = [0, 129], sizes = [2, 256], strides = [1, 1]} : vector<2x512xf32> to vector<2x256xf32>
    %108 = vector.broadcast %3 : vector<1x256xf32> to vector<2x256xf32>
    %109 = arith.mulf %107, %108 : vector<2x256xf32>
    %110 = vector.extract_strided_slice %73 {offsets = [5, 0, 0], sizes = [1, 4, 2], strides = [1, 1, 1]} : vector<9x4x2xf32> to vector<1x4x2xf32>
    %111 = vector.shape_cast %110 : vector<1x4x2xf32> to vector<4x2xf32>
    %cst_33 = arith.constant dense<0.000000e+00> : vector<4x256xf32>
    %112 = tpu.matmul %111, %109, %cst_33 {dimension_numbers = #tpu.dot_dimension_numbers<[1], [0], [0], [1], [0, 0, 1, 1], [], []>} : vector<4x2xf32>, vector<2x256xf32>, vector<4x256xf32> -> vector<4x256xf32>
    %113 = arith.addf %106, %112 : vector<4x256xf32>
    %114 = vector.extract_strided_slice %76 {offsets = [0, 143], sizes = [2, 256], strides = [1, 1]} : vector<2x512xf32> to vector<2x256xf32>
    %115 = vector.broadcast %2 : vector<1x256xf32> to vector<2x256xf32>
    %116 = arith.mulf %114, %115 : vector<2x256xf32>
    %117 = vector.extract_strided_slice %73 {offsets = [6, 0, 0], sizes = [1, 4, 2], strides = [1, 1, 1]} : vector<9x4x2xf32> to vector<1x4x2xf32>
    %118 = vector.shape_cast %117 : vector<1x4x2xf32> to vector<4x2xf32>
    %cst_34 = arith.constant dense<0.000000e+00> : vector<4x256xf32>
    %119 = tpu.matmul %118, %116, %cst_34 {dimension_numbers = #tpu.dot_dimension_numbers<[1], [0], [0], [1], [0, 0, 1, 1], [], []>} : vector<4x2xf32>, vector<2x256xf32>, vector<4x256xf32> -> vector<4x256xf32>
    %120 = arith.addf %113, %119 : vector<4x256xf32>
    %121 = vector.extract_strided_slice %76 {offsets = [0, 144], sizes = [2, 256], strides = [1, 1]} : vector<2x512xf32> to vector<2x256xf32>
    %122 = vector.extract_strided_slice %73 {offsets = [7, 0, 0], sizes = [1, 4, 2], strides = [1, 1, 1]} : vector<9x4x2xf32> to vector<1x4x2xf32>
    %123 = vector.shape_cast %122 : vector<1x4x2xf32> to vector<4x2xf32>
    %cst_35 = arith.constant dense<0.000000e+00> : vector<4x256xf32>
    %124 = tpu.matmul %123, %121, %cst_35 {dimension_numbers = #tpu.dot_dimension_numbers<[1], [0], [0], [1], [0, 0, 1, 1], [], []>} : vector<4x2xf32>, vector<2x256xf32>, vector<4x256xf32> -> vector<4x256xf32>
    %125 = arith.addf %120, %124 : vector<4x256xf32>
    %126 = vector.extract_strided_slice %76 {offsets = [0, 145], sizes = [2, 256], strides = [1, 1]} : vector<2x512xf32> to vector<2x256xf32>
    %127 = vector.broadcast %3 : vector<1x256xf32> to vector<2x256xf32>
    %128 = arith.mulf %126, %127 : vector<2x256xf32>
    %129 = vector.extract_strided_slice %73 {offsets = [8, 0, 0], sizes = [1, 4, 2], strides = [1, 1, 1]} : vector<9x4x2xf32> to vector<1x4x2xf32>
    %130 = vector.shape_cast %129 : vector<1x4x2xf32> to vector<4x2xf32>
    %cst_36 = arith.constant dense<0.000000e+00> : vector<4x256xf32>
    %131 = tpu.matmul %130, %128, %cst_36 {dimension_numbers = #tpu.dot_dimension_numbers<[1], [0], [0], [1], [0, 0, 1, 1], [], []>} : vector<4x2xf32>, vector<2x256xf32>, vector<4x256xf32> -> vector<4x256xf32>
    %132 = arith.addf %125, %131 : vector<4x256xf32>
    %133 = vector.broadcast %74 : vector<4x1xf32> to vector<4x256xf32>
    %134 = arith.addf %132, %133 : vector<4x256xf32>
    %cst_37 = arith.constant 0.000000e+00 : f32
    %135 = vector.broadcast %cst_37 : f32 to vector<4x256xf32>
    %136 = arith.subf %135, %134 : vector<4x256xf32>
    %137 = math.exp %136 : vector<4x256xf32>
    %cst_38 = arith.constant 1.000000e+00 : f32
    %138 = vector.broadcast %cst_38 : f32 to vector<4x256xf32>
    %139 = arith.addf %138, %137 : vector<4x256xf32>
    %140 = tpu.reciprocal %139 {approx = true} : vector<4x256xf32> -> vector<4x256xf32>
    %141 = arith.mulf %134, %140 : vector<4x256xf32>
    %142 = arith.addf %141, %1 : vector<4x256xf32>
    %c0_39 = arith.constant 0 : index
    %c0_40 = arith.constant 0 : index
    %c0_41 = arith.constant 0 : index
    %143 = vector.load %arg8[%c0_39, %c0_40, %c0_41] : memref<1x4x256xf32, #tpu.memory_space<vmem>>, vector<1x4x256xf32>
    %144 = vector.shape_cast %143 : vector<1x4x256xf32> to vector<4x256xf32>
    %145 = vector.shape_cast %142 : vector<4x256xf32> to vector<1x4x256xf32>
    tpu.vector_store %arg8[%c0_39, %c0_40, %c0_41], %145 {strides = array<i32>} : memref<1x4x256xf32, #tpu.memory_space<vmem>>, vector<1x4x256xf32>,
    return
  }
  func.func @transform_0(%arg0: i32) -> (i32, i32, i32) {
    %c0_i32 = arith.constant 0 : i32
    %c0_i32_0 = arith.constant 0 : i32
    %c0_i32_1 = arith.constant 0 : i32
    return %arg0, %c0_i32, %c0_i32_0 : i32, i32, i32
  }
  func.func @transform_1(%arg0: i32) -> (i32, i32) {
    %c0_i32 = arith.constant 0 : i32
    %c0_i32_0 = arith.constant 0 : i32
    %c0_i32_1 = arith.constant 0 : i32
    return %c0_i32, %c0_i32_0 : i32, i32
  }
  func.func @transform_2(%arg0: i32) -> (i32, i32) {
    %c0_i32 = arith.constant 0 : i32
    %c0_i32_0 = arith.constant 0 : i32
    %c0_i32_1 = arith.constant 0 : i32
    return %c0_i32, %c0_i32_0 : i32, i32
  }
  func.func @transform_3(%arg0: i32) -> (i32, i32, i32) {
    %c0_i32 = arith.constant 0 : i32
    %c0_i32_0 = arith.constant 0 : i32
    %c0_i32_1 = arith.constant 0 : i32
    %c0_i32_2 = arith.constant 0 : i32
    return %c0_i32, %c0_i32_0, %c0_i32_1 : i32, i32, i32
  }
  func.func @transform_4(%arg0: i32) -> (i32, i32) {
    %c0_i32 = arith.constant 0 : i32
    %c0_i32_0 = arith.constant 0 : i32
    %c0_i32_1 = arith.constant 0 : i32
    return %c0_i32, %c0_i32_0 : i32, i32
  }
  func.func @transform_5(%arg0: i32) -> (i32, i32, i32) {
    %c0_i32 = arith.constant 0 : i32
    %c0_i32_0 = arith.constant 0 : i32
    %c0_i32_1 = arith.constant 0 : i32
    %c0_i32_2 = arith.constant 0 : i32
    return %c0_i32, %c0_i32_0, %c0_i32_1 : i32, i32, i32
  }
  func.func @transform_6(%arg0: i32) -> (i32, i32) {
    %c0_i32 = arith.constant 0 : i32
    %c0_i32_0 = arith.constant 0 : i32
    %c0_i32_1 = arith.constant 0 : i32
    return %c0_i32, %c0_i32_0 : i32, i32
  }
  func.func @transform_7(%arg0: i32) -> (i32, i32, i32) {
    %c0_i32 = arith.constant 0 : i32
    %c0_i32_0 = arith.constant 0 : i32
    %c0_i32_1 = arith.constant 0 : i32
    return %arg0, %c0_i32, %c0_i32_0 : i32, i32, i32
  }
}

</mosaic_0001>

<bundles_post_ra>
// kernel: bottleneck_forward.1
= control target key start
LH: loop header
LB: loop body
LE: loop exit
PB: predicated region body
PF: predicated region fallthrough
CT: control target
= control target key end

     0   :  { %s2283_s24 = smov 0   ;;  %s2671_s0 = inlined_call_operand.vmem [shape: f32[2,4,256], index: 0, kind: input, shape index: {}]   ;;  %s2672_s1 = inlined_call_operand.vmem [shape: f32[1,256], index: 1, kind: input, shape index: {}]   ;;  %s2673_s2 = inlined_call_operand.vmem [shape: f32[1,256], index: 2, kind: input, shape index: {}]   ;;  %s2674_s3 = inlined_call_operand.vmem [shape: f32[9,2,4], index: 3, kind: input, shape index: {}]   ;;  %s2675_s4 = inlined_call_operand.vmem [shape: f32[2,1], index: 4, kind: input, shape index: {}]   ;;  %s2676_s5 = inlined_call_operand.vmem [shape: f32[9,4,2], index: 5, kind: input, shape index: {}]   ;;  %s2677_s6 = inlined_call_operand.vmem [shape: f32[4,1], index: 6, kind: input, shape index: {}]   ;;  %s2678_s7 = inlined_call_operand.vmem [shape: f32[2,4,256], index: 7, kind: output, shape index: {}]  }
   0x1 LB: > { %s2090_s25 = sadd.s32 4294967295, %s2231_s24   ;;  %p2094_p0 = scmp.ge.s32.totalorder %s2231_s24, 1  ;;  %s2231_s24 = sphi %s2283_s24, %s17_s24  }
   0x2   : > { %p237_p1 = scmp.lt.s32.totalorder %s2231_s24, 3 }
   0x4   : > { %p238_p2 = pnand %p2094_p0, %p237_p1 }
   0x5   : > { %v296_v0 = vlaneseq (!%p238_p2)  ;;  %v2233_v2 = vmov (!%p238_p2), 0.0   ;;  %v280_v3 = vld [vmem:[%s2672_s1] sm:$0x3] (!%p238_p2)  ;;  %s2234_s30 = smov (!%p238_p2), 111   ;;  %s2235_s8 = smov (!%p238_p2), 113   ;;  %vm308_vm0 = vcmask (!%p238_p2), 908288  }
   0x6   : > { %241 = sbr.rel (%p238_p2) target bundleno = 992 (0x3e0), region = 48  ;;  %399 = vmatprep.mubr.f32.mxu0 (!%p238_p2), %v2233_v2  ;;  %1300 = vmatprep.mubr.f32.mxu1 (!%p238_p2), %v2233_v2  ;;  %v281_v4 = vld [vmem:[%s2673_s2] sm:$0x3] (!%p238_p2)  ;;  %p269_p3 = scmp.lt.s32.totalorder (!%p238_p2), %s2090_s25, 1  ;;  %vm509_vm1 = vcmask (!%p238_p2), 924672   ;;  %vm613_vm2 = vcmask (!%p238_p2), 1039360  }
   0x7   : > { %v297_v1 = vshrl.u32 (!%p238_p2), %v296_v0, 7  ;;  %s2236_s9 = smov (!%p238_p2), 127   ;;  %s2237_s11 = smov (!%p238_p2), 1   ;;  %vm630_vm3 = vcmask (!%p238_p2), 7168   ;;  %vm323_vm4 = vcmask (!%p238_p2), 130048   ;;  %vm330_vm5 = vcmask (!%p238_p2), 1043456  }
   0x8   : > { %s2238_s15 = smov (!%p238_p2), 15   ;;  %s2239_s16 = smov (!%p238_p2), 16   ;;  %vm526_vm6 = vcmask (!%p238_p2), 121856   ;;  %v283_v43 = vld [vmem:[%s2674_s3 + $0x2] sm:$0x3] (!%p238_p2)  ;;  %vm326_vm7 = vcmask (!%p238_p2), 31744  }
   0x9   : > { %v298_v5 = vsub.s32 (!%p238_p2), 0, %v297_v1  ;;  %v302_v6 = vsub.s32 (!%p238_p2), 1, %v297_v1  ;;  %s2240_s17 = smov (!%p238_p2), 17   ;;  %vm415_vm8 = vcmask (!%p238_p2), 138240   ;;  %s2241_s20 = smov (!%p238_p2), 112   ;;  %v2242_v56 = vmov (!%p238_p2), 0  }
   0xa   : > { %v291_v55 = vld [vmem:[%s2675_s4] sm:$0x3] (!%p238_p2)  ;;  %2207 = vset.pattern.permute.xlu0 (!%p238_p2), %v2242_v56  ;;  %vm1003_vm9 = vcmask (!%p238_p2), 916480   ;;  %vm1231_vm10 = vcmask (!%p238_p2), 1041408   ;;  %vm1227_vm11 = vcmask (!%p238_p2), 15360  }
   0xb   : > { %v299_v7 = vrot.slane (!%p238_p2), %v280_v3, %v298_v5  ;;  %v500_v8 = vrot.slane (!%p238_p2), %v281_v4, %v298_v5  ;;  %v303_v9 = vrot.slane (!%p238_p2), %v280_v3, %v302_v6  ;;  %v504_v10 = vrot.slane (!%p238_p2), %v281_v4, %v302_v6  ;;  %v282_v62 = vld [vmem:[%s2674_s3] sm:$0x3] (!%p238_p2) }
   0xd   : > { %304 = vrot.lane.b32.xlu0 %v299_v7, %s2234_s30  ;;  %505 = vrot.lane.b32.xlu1 %v500_v8, %s2235_s8  ;;  %s2680_s25 = smov (!%p269_p3, %s2090_s25), 1 }
   0xe   : > { %s2155_s10 = sshll.u32 %s2680_s25, 3 }
   0xf   : > { %s273_s14 = scalar_lea.vmem %s2671_s0, %s2155_s10 }
  0x10   : > { %v2315_v11 = vld [vmem:[%s273_s14] sm:$0xff] }
  0x11   : > { %306 = vrot.lane.b32.xlu0 %v303_v9, %s2234_s30  ;;  %507 = vrot.lane.b32.xlu1 %v504_v10, %s2235_s8  ;;  %v2321_v12 = vcombine.high %v2315_v11, %v2315_v11 }
  0x15   : > { %611 = vrot.lane.b32.xlu1 %v303_v9, %s2236_s9  ;;  %609 = vrot.lane.b32.xlu0 %v299_v7, %s2236_s9 }
  0x19   : > { %795 = vrot.lane.b32.xlu1 %v504_v10, %s2237_s11  ;;  %793 = vrot.lane.b32.xlu0 %v500_v8, %s2237_s11 }
  0x1d   : > { %897 = vrot.lane.b32.xlu1 %v303_v9, %s2238_s15  ;;  %895 = vrot.lane.b32.xlu0 %v299_v7, %s2238_s15  ;;  %v284_v7 = vld [vmem:[%s2674_s3 + $0x4] sm:$0x3] }
  0x21   : > { %319 = vrot.lane.b32.xlu0 %v2315_v11, %s2239_s16  ;;  %321 = vrot.lane.b32.xlu1 %v2321_v12, %s2239_s16 }
  0x25   : > { %317 = vrot.lane.b32.xlu0 %v2233_v2, %s2239_s16  ;;  %1086 = vrot.lane.b32.xlu1 %v500_v8, %s2240_s17 }
  0x29   : > { %1088 = vrot.lane.b32.xlu0 %v504_v10, %s2240_s17 }
  0x7f   : > { %v305_v13 = vpop.permute.xlu0 %304  ;;  %v506_v14 = vpop.permute.xlu1 %505 }
  0x80   : > { %v313_v24 = vmul.f32 0.0, %v305_v13  ;;  %v514_v28 = vmul.f32 0.0, %v506_v14 }
  0x83   : > { %v2331_v15 = vpop.permute.xlu0 %306  ;;  %v2333_v16 = vpop.permute.xlu1 %507 }
  0x84   : > { %v2337_v17 = vsel %vm308_vm0, %v305_v13, %v2331_v15  ;;  %v315_v18 = vmul.f32 %v2331_v15, %v2321_v12  ;;  %v2343_v19 = vsel %vm509_vm1, %v506_v14, %v2333_v16  ;;  %v516_v25 = vmul.f32 %v2333_v16, %v2321_v12  ;;  %v285_v14 = vld [vmem:[%s2674_s3 + $0x6] sm:$0x3] }
  0x85   : > { %v314_v20 = vmul.f32 %v2337_v17, %v2315_v11  ;;  %v515_v21 = vmul.f32 %v2343_v19, %v2315_v11 }
  0x86   : > { %413 = vrot.lane.b32.xlu0 %v315_v18, %s2240_s17 }
  0x87   : > { %411 = vrot.lane.b32.xlu1 %v314_v20, %s2240_s17  ;;  %v2351_v22 = vpop.permute.xlu1 %611  ;;  %v610_v23 = vpop.permute.xlu0 %609 }
  0x88   : > { %v2361_v29 = vsel %vm613_vm2, %v610_v23, %v2351_v22  ;;  %v620_v30 = vmul.f32 %v2351_v22, %v2321_v12  ;;  %v618_v36 = vmul.f32 0.0, %v610_v23 }
  0x89   : > { %v619_v31 = vmul.f32 %v2361_v29, %v2315_v11 }
  0x8a   : > { %522 = vrot.lane.b32.xlu0 %v515_v21, %s2238_s15 }
  0x8b   : > { %409 = vrot.lane.b32.xlu1 %v313_v24, %s2240_s17  ;;  %v796_v26 = vpop.permute.xlu1 %795  ;;  %v2357_v27 = vpop.permute.xlu0 %793 }
  0x8c   : > { %v2371_v32 = vsel %vm630_vm3, %v2357_v27, %v796_v26  ;;  %v801_v40 = vmul.f32 %v2357_v27, %v2315_v11  ;;  %v803_v41 = vmul.f32 0.0, %v796_v26 }
  0x8d   : > { %v802_v35 = vmul.f32 %v2371_v32, %v2321_v12 }
  0x8e   : > { %520 = vrot.lane.b32.xlu0 %v514_v28, %s2238_s15 }
  0x8f   : > { %524 = vrot.lane.b32.xlu1 %v516_v25, %s2238_s15  ;;  %v898_v33 = vpop.permute.xlu1 %897  ;;  %v2373_v34 = vpop.permute.xlu0 %895  ;;  %v286_v25 = vld [vmem:[%s2674_s3 + $0x8] sm:$0x3] }
  0x90   : > { %v2392_v44 = vsel %vm526_vm6, %v2373_v34, %v898_v33  ;;  %v905_v46 = vmul.f32 0.0, %v898_v33  ;;  %v903_v48 = vmul.f32 %v2373_v34, %v2315_v11 }
  0x91   : > { %v904_v47 = vmul.f32 %v2392_v44, %v2321_v12 }
  0x92   : > { %628 = vrot.lane.b32.xlu0 %v620_v30, %s2237_s11 }
  0x93   : > { %626 = vrot.lane.b32.xlu1 %v619_v31, %s2237_s11  ;;  %v320_v37 = vpop.permute.xlu0 %319  ;;  %v322_v38 = vpop.permute.xlu1 %321 }
  0x94   : > { %v325_v39 = vsel %vm323_vm4, %v320_v37, %v322_v38 }
  0x95   : > { %2099 = vmatprep.subr.msk.mxu0 %vm330_vm5, %v325_v39 }
  0x96   : > { %809 = vrot.lane.b32.xlu0 %v802_v35, %s2236_s9  ;;  %v287_v35 = vld [vmem:[%s2674_s3 + $0xa] sm:$0x3] }
  0x97   : > { %624 = vrot.lane.b32.xlu1 %v618_v36, %s2237_s11  ;;  %v2385_v42 = vpop.permute.xlu0 %317  ;;  %v2407_v50 = vpop.permute.xlu1 %1086 }
  0x98   : > { %v324_v45 = vsel %vm323_vm4, %v2385_v42, %v320_v37  ;;  %v1094_v54 = vmul.f32 %v2407_v50, %v2315_v11 }
  0x99   : > { %2100 = vmatpush1.msk.msra.mxu0 %vm330_vm5, %v324_v45 }
  0x9a   : > { %807 = vrot.lane.b32.xlu0 %v801_v40, %s2236_s9  ;;  %2101 = vmatmul.mubr.msk.f32.vlgmr.msra.gmra.mrb[0].mxu0 %vm326_vm7, %v283_v43  ;;  %v288_v40 = vld [vmem:[%s2674_s3 + $0xc] sm:$0x3] }
  0x9b   : > { %811 = vrot.lane.b32.xlu1 %v803_v41, %s2236_s9  ;;  %489 = vmatprep.mubr.f32.mxu0 %v2233_v2  ;;  %v1089_v49 = vpop.permute.xlu0 %1088 }
  0x9c   : > { %v2414_v51 = vsel %vm415_vm8, %v2407_v50, %v1089_v49  ;;  %v1096_v52 = vmul.f32 0.0, %v1089_v49  ;;  %v290_v49 = vld [vmem:[%s2674_s3 + $0x10] sm:$0x3] }
  0x9d   : > { %v1095_v53 = vmul.f32 %v2414_v51, %v2321_v12 }
  0x9e   : > { %913 = vrot.lane.b32.xlu0 %v905_v46, %s2235_s8 }
  0x9f   : > { %911 = vrot.lane.b32.xlu1 %v904_v47, %s2235_s8  ;;  %v289_v47 = vld [vmem:[%s2674_s3 + $0xe] sm:$0x3] }
  0xa2   : > { %999 = vrot.lane.b32.xlu0 %v2321_v12, %s2241_s20 }
  0xa3   : > { %909 = vrot.lane.b32.xlu1 %v903_v48, %s2235_s8 }
  0xa6   : > { %997 = vrot.lane.b32.xlu0 %v2315_v11, %s2241_s20 }
  0xa7   : > { %1001 = vrot.lane.b32.xlu1 %v2233_v2, %s2241_s20 }
  0xaa   : > { %1104 = vrot.lane.b32.xlu0 %v1096_v52, %s2234_s30 }
  0xab   : > { %1102 = vrot.lane.b32.xlu1 %v1095_v53, %s2234_s30 }
  0xae   : > { %1190 = vperm.xlu0 %2207, %v291_v55  }
  0xaf   : > { %1100 = vrot.lane.b32.xlu1 %v1094_v54, %s2234_s30 }
  0xf8   : > { %v414_v57 = vpop.permute.xlu0 %413 }
  0xf9   : > { %v412_v58 = vpop.permute.xlu1 %411 }
  0xfa   : > { %v417_v59 = vsel %vm415_vm8, %v412_v58, %v414_v57 }
  0xfb   : > { %2102 = vmatprep.subr.msk.mxu0 %vm330_vm5, %v417_v59 }
  0xfc   : > { %v523_v60 = vpop.permute.xlu0 %522 }
  0xfd   : > { %v2432_v61 = vpop.permute.xlu1 %409 }
  0xfe   : > { %v416_v63 = vsel %vm415_vm8, %v2432_v61, %v412_v58 }
  0xff   : > { %2103 = vmatpush1.msk.msra.mxu0 %vm330_vm5, %v416_v63 }
 0x100   : > { %2104 = vmatmul.mubr.msk.f32.vlgmr.msra.gmra.mrb[0].mxu0 %vm326_vm7, %v282_v62  ;;  %v2441_v0 = vpop.permute.xlu0 %520 }
 0x101   : > { %v525_v1 = vpop.permute.xlu1 %524  ;;  %600 = vmatprep.mubr.f32.mxu0 %v2233_v2  ;;  %v527_v4 = vsel %vm526_vm6, %v2441_v0, %v523_v60 }
 0x102   : > { %v528_v3 = vsel %vm526_vm6, %v523_v60, %v525_v1 }
 0x103   : > { %2105 = vmatprep.subr.msk.mxu0 %vm330_vm5, %v528_v3 }
 0x104   : > { %2106 = vmatpush1.msk.msra.mxu0 %vm330_vm5, %v527_v4  ;;  %v629_v5 = vpop.permute.xlu0 %628 }
 0x105   : > { %v627_v6 = vpop.permute.xlu1 %626 }
 0x106   : > { %v632_v8 = vsel %vm630_vm3, %v627_v6, %v629_v5 }
 0x107   : > { %2108 = vmatprep.subr.msk.mxu0 %vm330_vm5, %v632_v8 }
 0x108   : > { %2107 = vmatmul.mubr.msk.f32.vlgmr.msra.gmra.mrb[0].mxu0 %vm326_vm7, %v284_v7  ;;  %v810_v13 = vpop.permute.xlu0 %809 }
 0x109   : > { %v2455_v9 = vpop.permute.xlu1 %624  ;;  %704 = vmatprep.mubr.f32.mxu0 %v2233_v2 }
 0x10a   : > { %v631_v10 = vsel %vm630_vm3, %v2455_v9, %v627_v6 }
 0x10b   : > { %2109 = vmatpush1.msk.msra.mxu0 %vm330_vm5, %v631_v10 }
 0x10c   : > { %2111 = vmatprep.subr.msk.mxu0 %vm330_vm5, %v2321_v12  ;;  %v808_v21 = vpop.permute.xlu0 %807 }
 0x10d   : > { %v2466_v18 = vpop.permute.xlu1 %811  ;;  %v813_v26 = vsel %vm613_vm2, %v808_v21, %v810_v13 }
 0x10e   : > { %v814_v20 = vsel %vm613_vm2, %v810_v13, %v2466_v18 }
 0x110   : > { %2110 = vmatmul.mubr.msk.f32.vlgmr.msra.gmra.mrb[0].mxu0 %vm326_vm7, %v285_v14  ;;  %v2475_v24 = vpop.permute.xlu0 %913 }
 0x111   : > { %2112 = vmatpush1.msk.msra.mxu0 %vm330_vm5, %v2315_v11  ;;  %784 = vmatprep.mubr.f32.mxu0 %v2233_v2  ;;  %v912_v23 = vpop.permute.xlu1 %911 }
 0x112   : > { %2114 = vmatprep.subr.msk.mxu0 %vm330_vm5, %v814_v20  ;;  %v916_v28 = vsel %vm509_vm1, %v912_v23, %v2475_v24 }
 0x114   : > { %v1000_v31 = vpop.permute.xlu0 %999 }
 0x115   : > { %v910_v30 = vpop.permute.xlu1 %909 }
 0x116   : > { %v915_v36 = vsel %vm509_vm1, %v910_v30, %v912_v23  ;;  %v1208_v23 = vld [vmem:[%s2676_s5 + $0x4] sm:$0xf] }
 0x118   : > { %2113 = vmatmul.mubr.msk.f32.vlgmr.msra.gmra.mrb[0].mxu0 %vm326_vm7, %v286_v25  ;;  %v998_v38 = vpop.permute.xlu0 %997 }
 0x119   : > { %2115 = vmatpush1.msk.msra.mxu0 %vm330_vm5, %v813_v26  ;;  %886 = vmatprep.mubr.f32.mxu0 %v2233_v2  ;;  %v2487_v33 = vpop.permute.xlu1 %1001  ;;  %v1004_v43 = vsel %vm1003_vm9, %v998_v38, %v1000_v31 }
 0x11a   : > { %2117 = vmatprep.subr.msk.mxu0 %vm330_vm5, %v916_v28  ;;  %v1005_v37 = vsel %vm1003_vm9, %v1000_v31, %v2487_v33 }
 0x11c   : > { %v2499_v39 = vpop.permute.xlu0 %1104 }
 0x11d   : > { %v1103_v41 = vpop.permute.xlu1 %1102 }
 0x11e   : > { %v1107_v45 = vsel %vm308_vm0, %v1103_v41, %v2499_v39 }
 0x120   : > { %2116 = vmatmul.mubr.msk.f32.vlgmr.msra.gmra.mrb[0].mxu0 %vm326_vm7, %v287_v35  ;;  %v1207_v35 = vld [vmem:[%s2676_s5] sm:$0xf] }
 0x121   : > { %2118 = vmatpush1.msk.msra.mxu0 %vm330_vm5, %v915_v36  ;;  %988 = vmatprep.mubr.f32.mxu0 %v2233_v2  ;;  %v1101_v46 = vpop.permute.xlu1 %1100 }
 0x122   : > { %2120 = vmatprep.subr.msk.mxu0 %vm330_vm5, %v1005_v37  ;;  %v1106_v48 = vsel %vm308_vm0, %v1101_v46, %v1103_v41  ;;  %v1211_v46 = vld [vmem:[%s2676_s5 + $0x10] sm:$0xf] }
 0x128   : > { %2119 = vmatmul.mubr.msk.f32.vlgmr.msra.gmra.mrb[0].mxu0 %vm326_vm7, %v288_v40  ;;  %v1209_v40 = vld [vmem:[%s2676_s5 + $0x8] sm:$0xf] }
 0x129   : > { %2121 = vmatpush1.msk.msra.mxu0 %vm330_vm5, %v1004_v43  ;;  %1077 = vmatprep.mubr.f32.mxu0 %v2233_v2 }
 0x12a   : > { %2123 = vmatprep.subr.msk.mxu0 %vm330_vm5, %v1107_v45 }
 0x12d   : > { %v1191_v52 = vpop.permute.xlu0 %1190 }
 0x130   : > { %2122 = vmatmul.mubr.msk.f32.vlgmr.msra.gmra.mrb[0].mxu0 %vm326_vm7, %v289_v47 }
 0x131   : > { %2124 = vmatpush1.msk.msra.mxu0 %vm330_vm5, %v1106_v48  ;;  %1179 = vmatprep.mubr.f32.mxu0 %v2233_v2 }
 0x138   : > { %2125 = vmatmul.mubr.msk.f32.vlgmr.msra.gmra.mrb[0].mxu0 %vm326_vm7, %v290_v49 }
 0x20b   : > { %v1181_v53 = vpop.f32.mrb[0].mxu0 }
 0x20c   : > { %v1193_v54 = vadd.f32 %v1191_v52, %v1181_v53  ;;  %v1183_v55 = vpop.f32.mrb[1].mxu0 }
 0x20d   : > { %v1194_v56 = vadd.f32 %v1191_v52, %v1183_v55  ;;  %v1212_v52 = vld [vmem:[%s2676_s5 + $0x14] sm:$0xf] }
 0x20e   : > { %v1195_v57 = vsub.f32 0.0, %v1193_v54 }
 0x20f   : > { %v1196_v58 = vsub.f32 0.0, %v1194_v56 }
 0x210   : > { %v1197_v59 = vmul.f32 1.442695, %v1195_v57 }
 0x211   : > { %v1199_v60 = vmul.f32 1.442695, %v1196_v58 }
 0x212   : > { %2209 = vpow2.f32 %v1197_v59 }
 0x213   : > { %2211 = vpow2.f32 %v1199_v60  ;;  %v1214_v60 = vld [vmem:[%s2676_s5 + $0x1c] sm:$0xf] }
 0x21c   : > { %v2210_v62 = vpop.eup %2209 }
 0x21d   : > { %v2212_v63 = vpop.eup %2211  ;;  %v1201_v1 = vadd.f32 1.0, %v2210_v62 }
 0x21e   : > { %v1202_v3 = vadd.f32 1.0, %v2212_v63 }
 0x21f   : > { %2213 = vrcp.f32 %v1201_v1 }
 0x220   : > { %2215 = vrcp.f32 %v1202_v3 }
 0x229   : > { %v2214_v4 = vpop.eup %2213 }
 0x22a   : > { %v2522_v5 = vmul.f32 %v2214_v4, %v1193_v54  ;;  %v2216_v6 = vpop.eup %2215 }
 0x22b   : > { %v2528_v8 = vmul.f32 %v2216_v6, %v1194_v56  ;;  %v1213_v56 = vld [vmem:[%s2676_s5 + $0x18] sm:$0xf] }
 0x22c   : > { %1221 = vrot.lane.b32.xlu1 %v2522_v5, %s2239_s16  ;;  %v1217_v7 = vmul.f32 %v2522_v5, %v2337_v17  ;;  %v1393_v10 = vmul.f32 %v2522_v5, %v2343_v19  ;;  %v1483_v17 = vmul.f32 %v2522_v5, %v2361_v29 }
 0x22d   : > { %v1218_v13 = vmul.f32 %v2528_v8, %v2331_v15  ;;  %v1394_v14 = vmul.f32 %v2528_v8, %v2333_v16  ;;  %v1654_v19 = vmul.f32 %v2528_v8, %v2371_v32  ;;  %v1484_v15 = vmul.f32 %v2528_v8, %v2351_v22 }
 0x22e   : > { %1309 = vrot.lane.b32.xlu0 %v1217_v7, %s2240_s17  ;;  %v1744_v29 = vmul.f32 %v2528_v8, %v2392_v44  ;;  %v1653_v16 = vmul.f32 %v2522_v5, %v2357_v27  ;;  %v1743_v32 = vmul.f32 %v2522_v5, %v2373_v34  ;;  %v1920_v22 = vmul.f32 %v2528_v8, %v2414_v51  ;;  %v1216_v44 = vld [vmem:[%s2677_s6] sm:$0xf] }
 0x22f   : > { %v1919_v27 = vmul.f32 %v2522_v5, %v2407_v50 }
 0x230   : > { %1223 = vrot.lane.b32.xlu1 %v2528_v8, %s2239_s16 }
 0x232   : > { %1397 = vrot.lane.b32.xlu0 %v1393_v10, %s2238_s15 }
 0x234   : > { %1311 = vrot.lane.b32.xlu1 %v1218_v13, %s2240_s17 }
 0x236   : > { %1487 = vrot.lane.b32.xlu0 %v1483_v17, %s2237_s11 }
 0x238   : > { %1399 = vrot.lane.b32.xlu1 %v1394_v14, %s2238_s15 }
 0x23a   : > { %1659 = vrot.lane.b32.xlu0 %v1654_v19, %s2236_s9 }
 0x23c   : > { %1489 = vrot.lane.b32.xlu1 %v1484_v15, %s2237_s11 }
 0x23e   : > { %1749 = vrot.lane.b32.xlu0 %v1744_v29, %s2235_s8 }
 0x240   : > { %1657 = vrot.lane.b32.xlu1 %v1653_v16, %s2236_s9 }
 0x242   : > { %1835 = vrot.lane.b32.xlu0 %v2528_v8, %s2241_s20 }
 0x244   : > { %1747 = vrot.lane.b32.xlu1 %v1743_v32, %s2235_s8  ;;  %s278_s8 = scalar_lea.vmem %s2678_s7, %s2155_s10 }
 0x246   : > { %1925 = vrot.lane.b32.xlu0 %v1920_v22, %s2234_s30 }
 0x248   : > { %1833 = vrot.lane.b32.xlu1 %v2522_v5, %s2241_s20 }
 0x24a   : > { %2011 = vperm.xlu0 %2207, %v1216_v44  }
 0x24c   : > { %1923 = vrot.lane.b32.xlu1 %v1919_v27, %s2234_s30 }
 0x29e   : > { %v1222_v34 = vpop.permute.xlu1 %1221 }
 0x29f   : > { %v1225_v25 = vsel %vm323_vm4, %v2385_v42, %v1222_v34 }
 0x2a0   : > { %v1310_v20 = vpop.permute.xlu0 %1309 }
 0x2a1   : > { %v1313_v28 = vsel %vm415_vm8, %v2432_v61, %v1310_v20 }
 0x2a2   : > { %v1224_v21 = vpop.permute.xlu1 %1223 }
 0x2a3   : > { %v1226_v51 = vsel %vm323_vm4, %v1222_v34, %v1224_v21 }
 0x2a4   : > { %2126 = vmatprep.subr.msk.mxu1 %vm1231_vm10, %v1226_v51  ;;  %v1398_v30 = vpop.permute.xlu0 %1397 }
 0x2a5   : > { %2127 = vmatpush1.msk.msra.mxu1 %vm1231_vm10, %v1225_v25  ;;  %v1401_v36 = vsel %vm526_vm6, %v2441_v0, %v1398_v30  ;;  %v1210_v0 = vld [vmem:[%s2676_s5 + $0xc] sm:$0xf] }
 0x2a6   : > { %2128 = vmatmul.mubr.msk.f32.vlgmr.msra.gmra.mrb[0].mxu1 %vm1227_vm11, %v1208_v23  ;;  %v1312_v50 = vpop.permute.xlu1 %1311 }
 0x2a7   : > { %v1314_v26 = vsel %vm415_vm8, %v1310_v20, %v1312_v50  ;;  %1386 = vmatprep.mubr.f32.mxu1 %v2233_v2 }
 0x2a8   : > { %2129 = vmatprep.subr.msk.mxu1 %vm1231_vm10, %v1314_v26  ;;  %v1488_v37 = vpop.permute.xlu0 %1487 }
 0x2a9   : > { %2130 = vmatpush1.msk.msra.mxu1 %vm1231_vm10, %v1313_v28  ;;  %v1491_v41 = vsel %vm630_vm3, %v2455_v9, %v1488_v37 }
 0x2aa   : > { %v1400_v31 = vpop.permute.xlu1 %1399 }
 0x2ab   : > { %v1402_v42 = vsel %vm526_vm6, %v1398_v30, %v1400_v31 }
 0x2ac   : > { %2132 = vmatprep.subr.msk.mxu1 %vm1231_vm10, %v1402_v42  ;;  %v1660_v43 = vpop.permute.xlu0 %1659 }
 0x2ad   : > { %v1662_v45 = vsel %vm613_vm2, %v1660_v43, %v2466_v18 }
 0x2ae   : > { %v1490_v38 = vpop.permute.xlu1 %1489  ;;  %2131 = vmatmul.mubr.msk.f32.vlgmr.msra.gmra.mrb[0].mxu1 %vm1227_vm11, %v1207_v35 }
 0x2af   : > { %v1492_v61 = vsel %vm630_vm3, %v1488_v37, %v1490_v38  ;;  %2133 = vmatpush1.msk.msra.mxu1 %vm1231_vm10, %v1401_v36  ;;  %1474 = vmatprep.mubr.f32.mxu1 %v2233_v2 }
 0x2b0   : > { %2135 = vmatprep.subr.msk.mxu1 %vm1231_vm10, %v1492_v61  ;;  %v1750_v47 = vpop.permute.xlu0 %1749 }
 0x2b1   : > { %v1752_v18 = vsel %vm509_vm1, %v1750_v47, %v2475_v24 }
 0x2b2   : > { %v1658_v9 = vpop.permute.xlu1 %1657 }
 0x2b3   : > { %v1661_v48 = vsel %vm613_vm2, %v1658_v9, %v1660_v43 }
 0x2b4   : > { %v1836_v53 = vpop.permute.xlu0 %1835 }
 0x2b5   : > { %v1838_v55 = vsel %vm1003_vm9, %v1836_v53, %v2487_v33 }
 0x2b6   : > { %2134 = vmatmul.mubr.msk.f32.vlgmr.msra.gmra.mrb[0].mxu1 %vm1227_vm11, %v1209_v40  ;;  %v1748_v49 = vpop.permute.xlu1 %1747 }
 0x2b7   : > { %2136 = vmatpush1.msk.msra.mxu1 %vm1231_vm10, %v1491_v41  ;;  %1564 = vmatprep.mubr.f32.mxu1 %v2233_v2  ;;  %v1751_v54 = vsel %vm509_vm1, %v1748_v49, %v1750_v47 }
 0x2b8   : > { %2138 = vmatprep.subr.msk.mxu1 %vm1231_vm10, %v2528_v8  ;;  %v1926_v57 = vpop.permute.xlu0 %1925 }
 0x2b9   : > { %v1928_v59 = vsel %vm308_vm0, %v1926_v57, %v2499_v39  ;;  %v1215_v39 = vld [vmem:[%s2676_s5 + $0x20] sm:$0xf] }
 0x2ba   : > { %v1834_v24 = vpop.permute.xlu1 %1833 }
 0x2bb   : > { %v1837_v58 = vsel %vm1003_vm9, %v1834_v24, %v1836_v53 }
 0x2be   : > { %2137 = vmatmul.mubr.msk.f32.vlgmr.msra.gmra.mrb[0].mxu1 %vm1227_vm11, %v1210_v0  ;;  %v1924_v33 = vpop.permute.xlu1 %1923 }
 0x2bf   : > { %2139 = vmatpush1.msk.msra.mxu1 %vm1231_vm10, %v2522_v5  ;;  %1644 = vmatprep.mubr.f32.mxu1 %v2233_v2  ;;  %v1927_v62 = vsel %vm308_vm0, %v1924_v33, %v1926_v57 }
 0x2c0   : > { %2141 = vmatprep.subr.msk.mxu1 %vm1231_vm10, %v1662_v45 }
 0x2c6   : > { %2140 = vmatmul.mubr.msk.f32.vlgmr.msra.gmra.mrb[0].mxu1 %vm1227_vm11, %v1211_v46 }
 0x2c7   : > { %2142 = vmatpush1.msk.msra.mxu1 %vm1231_vm10, %v1661_v48  ;;  %1734 = vmatprep.mubr.f32.mxu1 %v2233_v2 }
 0x2c8   : > { %2144 = vmatprep.subr.msk.mxu1 %vm1231_vm10, %v1752_v18 }
 0x2c9   : > { %v2012_v63 = vpop.permute.xlu0 %2011 }
 0x2ce   : > { %2143 = vmatmul.mubr.msk.f32.vlgmr.msra.gmra.mrb[0].mxu1 %vm1227_vm11, %v1212_v52 }
 0x2cf   : > { %2145 = vmatpush1.msk.msra.mxu1 %vm1231_vm10, %v1751_v54  ;;  %1824 = vmatprep.mubr.f32.mxu1 %v2233_v2 }
 0x2d0   : > { %2147 = vmatprep.subr.msk.mxu1 %vm1231_vm10, %v1838_v55 }
 0x2d6   : > { %2146 = vmatmul.mubr.msk.f32.vlgmr.msra.gmra.mrb[0].mxu1 %vm1227_vm11, %v1213_v56 }
 0x2d7   : > { %2148 = vmatpush1.msk.msra.mxu1 %vm1231_vm10, %v1837_v58  ;;  %1910 = vmatprep.mubr.f32.mxu1 %v2233_v2 }
 0x2d8   : > { %2150 = vmatprep.subr.msk.mxu1 %vm1231_vm10, %v1928_v59 }
 0x2de   : > { %2149 = vmatmul.mubr.msk.f32.vlgmr.msra.gmra.mrb[0].mxu1 %vm1227_vm11, %v1214_v60 }
 0x2df   : > { %2151 = vmatpush1.msk.msra.mxu1 %vm1231_vm10, %v1927_v62  ;;  %2000 = vmatprep.mubr.f32.mxu1 %v2233_v2 }
 0x2e6   : > { %2152 = vmatmul.mubr.msk.f32.vlgmr.msra.gmra.mrb[0].mxu1 %vm1227_vm11, %v1215_v39 }
 0x3b9   : > { %v2002_v1 = vpop.f32.mrb[0].mxu1 }
 0x3ba   : > { %v2014_v3 = vadd.f32 %v2012_v63, %v2002_v1  ;;  %v2004_v4 = vpop.f32.mrb[1].mxu1 }
 0x3bb   : > { %v2015_v5 = vadd.f32 %v2012_v63, %v2004_v4 }
 0x3bc   : > { %v2016_v6 = vsub.f32 0.0, %v2014_v3 }
 0x3bd   : > { %v2017_v7 = vsub.f32 0.0, %v2015_v5 }
 0x3be   : > { %v2018_v8 = vmul.f32 1.442695, %v2016_v6 }
 0x3bf   : > { %v2020_v10 = vmul.f32 1.442695, %v2017_v7 }
 0x3c0   : > { %2217 = vpow2.f32 %v2018_v8 }
 0x3c1   : > { %2219 = vpow2.f32 %v2020_v10 }
 0x3ca   : > { %v2218_v13 = vpop.eup %2217 }
 0x3cb   : > { %v2220_v2 = vpop.eup %2219  ;;  %v2022_v17 = vadd.f32 1.0, %v2218_v13 }
 0x3cc   : > { %v2023_v14 = vadd.f32 1.0, %v2220_v2 }
 0x3cd   : > { %2221 = vrcp.f32 %v2022_v17 }
 0x3ce   : > { %2223 = vrcp.f32 %v2023_v14 }
 0x3d7   : > { %v2222_v19 = vpop.eup %2221 }
 0x3d8   : > { %v2224_v15 = vpop.eup %2223  ;;  %v2026_v29 = vmul.f32 %v2222_v19, %v2014_v3 }
 0x3d9   : > { %v2027_v16 = vmul.f32 %v2224_v15, %v2015_v5 }
 0x3da   : > { %v2028_v32 = vadd.f32 %v2026_v29, %v2315_v11 }
 0x3db   : > { %v2029_v22 = vadd.f32 %v2027_v16, %v2321_v12 }
 0x3dd   : > { %v2032_v44 = vcombine.low %v2028_v32, %v2029_v22 }
 0x3df   : > { %2034 = vst [vmem:[%s278_s8] sm:$0xff] %v2032_v44 }
 0x3e0 PF: > { %s17_s24 = sadd.s32 1, %s2231_s24  }
 0x3e1   : > { %p14_p4 = scmp.ge.s32.totalorder %s17_s24, 4  }
 0x3e3   :  { %16 = sbr.rel (!%p14_p4) target bundleno = 1 (0x1), region = 78 }

</bundles_post_ra>
